<compile_context>
chip_gen: v6e
topology: v6e:2x2x1
jax: 0.10.0
libtpu: 0.0.40
codegen_flags: <defaults>
</compile_context>

<pallas_src>
import jax
import jax.numpy as jnp
from jax.experimental import pallas as pl
from jax.experimental.pallas import tpu as pltpu


def _round_up(v, m):
    return ((v + m - 1) // m) * m


def _pad_to(a, target_shape):
    pads = [(0, t - s) for s, t in zip(a.shape, target_shape)]
    return jnp.pad(a, pads)


def _leaky_relu(h):
    # f32 elementwise; one vmul + one vmax on the VPU.
    return jnp.maximum(h, 0.2 * h)


def mlp_kernel(x_ref,
               w1_ref, b1_ref,
               w2_ref, b2_ref,
               w3_ref, b3_ref,
               w4_ref, b4_ref,
               o_ref):
    cdt = w1_ref.dtype                     # compute (MXU operand) dtype
    h = x_ref[...].astype(cdt)

    # layer 1
    h = jnp.dot(h, w1_ref[...], preferred_element_type=jnp.float32) + b1_ref[...]
    h = _leaky_relu(h).astype(cdt)
    # layer 2
    h = jnp.dot(h, w2_ref[...], preferred_element_type=jnp.float32) + b2_ref[...]
    h = _leaky_relu(h).astype(cdt)
    # layer 3
    h = jnp.dot(h, w3_ref[...], preferred_element_type=jnp.float32) + b3_ref[...]
    h = _leaky_relu(h).astype(cdt)
    # layer 4 (no activation)
    h = jnp.dot(h, w4_ref[...], preferred_element_type=jnp.float32) + b4_ref[...]

    o_ref[...] = h.astype(o_ref.dtype)


def mlp_forward(x, params, *, batch_tile=256, compute_dtype=jnp.float32, lane=128):
    """x: (B, nin) float32. params: w1..w4 stored as (in, out), b1..b4 as (1, out).

    Equivalent to the PyTorch MLP: Linear -> LeakyReLU(0.2) x3 -> Linear.
    """
    B, nin = x.shape
    nh = params["w1"].shape[1]
    nout = params["w4"].shape[1]

    # --- lane-dense feature padding (multiples of 128) --------------------
    nin_p = _round_up(nin, lane)
    nh_p = _round_up(nh, lane)
    nout_p = _round_up(nout, lane)

    # --- batch tiling: big tiles, pad so any B works -----------------------
    bt = min(batch_tile, _round_up(B, 8))      # small B -> single grid step
    B_p = _round_up(B, bt)
    grid = (B_p // bt,)

    x_p = _pad_to(x, (B_p, nin_p))

    w1 = _pad_to(params["w1"], (nin_p, nh_p)).astype(compute_dtype)
    w2 = _pad_to(params["w2"], (nh_p, nh_p)).astype(compute_dtype)
    w3 = _pad_to(params["w3"], (nh_p, nh_p)).astype(compute_dtype)
    w4 = _pad_to(params["w4"], (nh_p, nout_p)).astype(compute_dtype)
    # biases stay f32: bias add + LeakyReLU are done in f32 (v5e has no bf16 VPU)
    b1 = _pad_to(params["b1"], (1, nh_p)).astype(jnp.float32)
    b2 = _pad_to(params["b2"], (1, nh_p)).astype(jnp.float32)
    b3 = _pad_to(params["b3"], (1, nh_p)).astype(jnp.float32)
    b4 = _pad_to(params["b4"], (1, nout_p)).astype(jnp.float32)

    def rep(shape):
        # weights / biases: same full (constant) block at every grid step
        return pl.BlockSpec(shape, lambda i: (0, 0))

    in_specs = [
        pl.BlockSpec((bt, nin_p), lambda i: (i, 0)),   # x tiled over batch
        rep((nin_p, nh_p)), rep((1, nh_p)),
        rep((nh_p, nh_p)), rep((1, nh_p)),
        rep((nh_p, nh_p)), rep((1, nh_p)),
        rep((nh_p, nout_p)), rep((1, nout_p)),
    ]
    out_specs = pl.BlockSpec((bt, nout_p), lambda i: (i, 0))

    out_p = pl.pallas_call(
        mlp_kernel,
        out_shape=jax.ShapeDtypeStruct((B_p, nout_p), x.dtype),
        grid=grid,
        in_specs=in_specs,
        out_specs=out_specs,
        compiler_params=pltpu.CompilerParams(
            dimension_semantics=("parallel",)),
    )(x_p, w1, b1, w2, b2, w3, b3, w4, b4)

    # strip batch + feature padding
    return out_p[:B, :nout]


def init_mlp_params(key, nin, nout, nh):
    """Deterministic synthetic init. Weights stored as (in, out) = W^T of nn.Linear."""
    ks = jax.random.split(key, 8)

    def lin(kw, kb, fan_in, fan_out):
        bound = 1.0 / jnp.sqrt(fan_in)          # mimic PyTorch uniform init
        w = jax.random.uniform(kw, (fan_in, fan_out), jnp.float32, -bound, bound)
        b = jax.random.uniform(kb, (1, fan_out), jnp.float32, -bound, bound)
        return w, b

    w1, b1 = lin(ks[0], ks[1], nin, nh)
    w2, b2 = lin(ks[2], ks[3], nh, nh)
    w3, b3 = lin(ks[4], ks[5], nh, nh)
    w4, b4 = lin(ks[6], ks[7], nh, nout)
    return dict(w1=w1, b1=b1, w2=w2, b2=b2, w3=w3, b3=b3, w4=w4, b4=b4)


def mlp_reference(x, p):
    def lrelu(h):
        return jnp.where(h > 0, h, 0.2 * h)
    h = lrelu(x @ p["w1"] + p["b1"])
    h = lrelu(h @ p["w2"] + p["b2"])
    h = lrelu(h @ p["w3"] + p["b3"])
    return h @ p["w4"] + p["b4"]


if __name__ == "__main__":
    key = jax.random.PRNGKey(0)
    kx, kp = jax.random.split(key)

    # Normalizing-flow-style shapes: nin=nout=4, hidden=32, batch=16
    B, nin, nout, nh = 16, 4, 4, 32
    x = jax.random.normal(kx, (B, nin), dtype=jnp.float32)
    params = init_mlp_params(kp, nin, nout, nh)

    ref = mlp_reference(x, params)

    # f32 MXU operands (exact path)
    out_f32 = jax.block_until_ready(mlp_forward(x, params, compute_dtype=jnp.float32))
    assert out_f32.shape == (B, nout)
    assert jnp.allclose(out_f32, ref, atol=1e-5, rtol=1e-5), "f32 mismatch vs reference"

    # bf16 MXU operands, f32 accumulation (fast path on v6e/v7x)
    out_bf16 = jax.block_until_ready(mlp_forward(x, params, compute_dtype=jnp.bfloat16))
    assert out_bf16.shape == (B, nout)
    assert jnp.allclose(out_bf16, ref, atol=5e-2, rtol=5e-2), "bf16 mismatch vs reference"

    print("KERNEL_OK")
</pallas_src>

<mosaic_0001>
module attributes {stable_mosaic.version = 11 : i64} {
  func.func @mlp_kernel(%arg0: i32, %arg1: memref<16x128xf32, #tpu.memory_space<vmem>>, %arg2: memref<128x128xf32, #tpu.memory_space<vmem>>, %arg3: memref<1x128xf32, #tpu.memory_space<vmem>>, %arg4: memref<128x128xf32, #tpu.memory_space<vmem>>, %arg5: memref<1x128xf32, #tpu.memory_space<vmem>>, %arg6: memref<128x128xf32, #tpu.memory_space<vmem>>, %arg7: memref<1x128xf32, #tpu.memory_space<vmem>>, %arg8: memref<128x128xf32, #tpu.memory_space<vmem>>, %arg9: memref<1x128xf32, #tpu.memory_space<vmem>>, %arg10: memref<16x128xf32, #tpu.memory_space<vmem>>) attributes {dimension_semantics = [#tpu.dimension_semantics<parallel>], iteration_bounds = array<i64: 1>, scalar_prefetch = 0 : i64, scratch_operands = 0 : i64, tpu.core_type = #tpu.core_type<tc>, window_params = [{transform_indices = @transform_0, window_bounds = array<i64: 16, 128>}, {pipeline_mode = #tpu.pipeline_mode<synchronous>, transform_indices = @transform_1, window_bounds = array<i64: 128, 128>}, {pipeline_mode = #tpu.pipeline_mode<synchronous>, transform_indices = @transform_2, window_bounds = array<i64: 1, 128>}, {pipeline_mode = #tpu.pipeline_mode<synchronous>, transform_indices = @transform_3, window_bounds = array<i64: 128, 128>}, {pipeline_mode = #tpu.pipeline_mode<synchronous>, transform_indices = @transform_4, window_bounds = array<i64: 1, 128>}, {pipeline_mode = #tpu.pipeline_mode<synchronous>, transform_indices = @transform_5, window_bounds = array<i64: 128, 128>}, {pipeline_mode = #tpu.pipeline_mode<synchronous>, transform_indices = @transform_6, window_bounds = array<i64: 1, 128>}, {pipeline_mode = #tpu.pipeline_mode<synchronous>, transform_indices = @transform_7, window_bounds = array<i64: 128, 128>}, {pipeline_mode = #tpu.pipeline_mode<synchronous>, transform_indices = @transform_8, window_bounds = array<i64: 1, 128>}, {transform_indices = @transform_9, window_bounds = array<i64: 16, 128>}]} {
    %c0 = arith.constant 0 : index
    %c0_0 = arith.constant 0 : index
    %0 = vector.load %arg1[%c0, %c0_0] : memref<16x128xf32, #tpu.memory_space<vmem>>, vector<16x128xf32>
    %c0_1 = arith.constant 0 : index
    %c0_2 = arith.constant 0 : index
    %1 = vector.load %arg2[%c0_1, %c0_2] : memref<128x128xf32, #tpu.memory_space<vmem>>, vector<128x128xf32>
    %cst = arith.constant dense<0.000000e+00> : vector<16x128xf32>
    %2 = tpu.matmul %0, %1, %cst {dimension_numbers = #tpu.dot_dimension_numbers<[1], [0], [0], [1], [0, 0, 1, 1], [], []>} : vector<16x128xf32>, vector<128x128xf32>, vector<16x128xf32> -> vector<16x128xf32>
    %c0_3 = arith.constant 0 : index
    %c0_4 = arith.constant 0 : index
    %3 = vector.load %arg3[%c0_3, %c0_4] : memref<1x128xf32, #tpu.memory_space<vmem>>, vector<1x128xf32>
    %4 = vector.broadcast %3 : vector<1x128xf32> to vector<16x128xf32>
    %5 = arith.addf %2, %4 : vector<16x128xf32>
    %cst_5 = arith.constant 2.000000e-01 : f32
    %6 = vector.broadcast %cst_5 : f32 to vector<16x128xf32>
    %7 = arith.mulf %6, %5 : vector<16x128xf32>
    %8 = arith.maximumf %5, %7 : vector<16x128xf32>
    %c0_6 = arith.constant 0 : index
    %c0_7 = arith.constant 0 : index
    %9 = vector.load %arg4[%c0_6, %c0_7] : memref<128x128xf32, #tpu.memory_space<vmem>>, vector<128x128xf32>
    %cst_8 = arith.constant dense<0.000000e+00> : vector<16x128xf32>
    %10 = tpu.matmul %8, %9, %cst_8 {dimension_numbers = #tpu.dot_dimension_numbers<[1], [0], [0], [1], [0, 0, 1, 1], [], []>} : vector<16x128xf32>, vector<128x128xf32>, vector<16x128xf32> -> vector<16x128xf32>
    %c0_9 = arith.constant 0 : index
    %c0_10 = arith.constant 0 : index
    %11 = vector.load %arg5[%c0_9, %c0_10] : memref<1x128xf32, #tpu.memory_space<vmem>>, vector<1x128xf32>
    %12 = vector.broadcast %11 : vector<1x128xf32> to vector<16x128xf32>
    %13 = arith.addf %10, %12 : vector<16x128xf32>
    %cst_11 = arith.constant 2.000000e-01 : f32
    %14 = vector.broadcast %cst_11 : f32 to vector<16x128xf32>
    %15 = arith.mulf %14, %13 : vector<16x128xf32>
    %16 = arith.maximumf %13, %15 : vector<16x128xf32>
    %c0_12 = arith.constant 0 : index
    %c0_13 = arith.constant 0 : index
    %17 = vector.load %arg6[%c0_12, %c0_13] : memref<128x128xf32, #tpu.memory_space<vmem>>, vector<128x128xf32>
    %cst_14 = arith.constant dense<0.000000e+00> : vector<16x128xf32>
    %18 = tpu.matmul %16, %17, %cst_14 {dimension_numbers = #tpu.dot_dimension_numbers<[1], [0], [0], [1], [0, 0, 1, 1], [], []>} : vector<16x128xf32>, vector<128x128xf32>, vector<16x128xf32> -> vector<16x128xf32>
    %c0_15 = arith.constant 0 : index
    %c0_16 = arith.constant 0 : index
    %19 = vector.load %arg7[%c0_15, %c0_16] : memref<1x128xf32, #tpu.memory_space<vmem>>, vector<1x128xf32>
    %20 = vector.broadcast %19 : vector<1x128xf32> to vector<16x128xf32>
    %21 = arith.addf %18, %20 : vector<16x128xf32>
    %cst_17 = arith.constant 2.000000e-01 : f32
    %22 = vector.broadcast %cst_17 : f32 to vector<16x128xf32>
    %23 = arith.mulf %22, %21 : vector<16x128xf32>
    %24 = arith.maximumf %21, %23 : vector<16x128xf32>
    %c0_18 = arith.constant 0 : index
    %c0_19 = arith.constant 0 : index
    %25 = vector.load %arg8[%c0_18, %c0_19] : memref<128x128xf32, #tpu.memory_space<vmem>>, vector<128x128xf32>
    %cst_20 = arith.constant dense<0.000000e+00> : vector<16x128xf32>
    %26 = tpu.matmul %24, %25, %cst_20 {dimension_numbers = #tpu.dot_dimension_numbers<[1], [0], [0], [1], [0, 0, 1, 1], [], []>} : vector<16x128xf32>, vector<128x128xf32>, vector<16x128xf32> -> vector<16x128xf32>
    %c0_21 = arith.constant 0 : index
    %c0_22 = arith.constant 0 : index
    %27 = vector.load %arg9[%c0_21, %c0_22] : memref<1x128xf32, #tpu.memory_space<vmem>>, vector<1x128xf32>
    %28 = vector.broadcast %27 : vector<1x128xf32> to vector<16x128xf32>
    %29 = arith.addf %26, %28 : vector<16x128xf32>
    %c0_23 = arith.constant 0 : index
    %c0_24 = arith.constant 0 : index
    %30 = vector.load %arg10[%c0_23, %c0_24] : memref<16x128xf32, #tpu.memory_space<vmem>>, vector<16x128xf32>
    tpu.vector_store %arg10[%c0_23, %c0_24], %29 {strides = array<i32>} : memref<16x128xf32, #tpu.memory_space<vmem>>, vector<16x128xf32>,
    return
  }
  func.func @transform_0(%arg0: i32) -> (i32, i32) {
    %c0_i32 = arith.constant 0 : i32
    %c0_i32_0 = arith.constant 0 : i32
    return %arg0, %c0_i32 : i32, i32
  }
  func.func @transform_1(%arg0: i32) -> (i32, i32) {
    %c0_i32 = arith.constant 0 : i32
    %c0_i32_0 = arith.constant 0 : i32
    %c0_i32_1 = arith.constant 0 : i32
    return %c0_i32, %c0_i32_0 : i32, i32
  }
  func.func @transform_2(%arg0: i32) -> (i32, i32) {
    %c0_i32 = arith.constant 0 : i32
    %c0_i32_0 = arith.constant 0 : i32
    %c0_i32_1 = arith.constant 0 : i32
    return %c0_i32, %c0_i32_0 : i32, i32
  }
  func.func @transform_3(%arg0: i32) -> (i32, i32) {
    %c0_i32 = arith.constant 0 : i32
    %c0_i32_0 = arith.constant 0 : i32
    %c0_i32_1 = arith.constant 0 : i32
    return %c0_i32, %c0_i32_0 : i32, i32
  }
  func.func @transform_4(%arg0: i32) -> (i32, i32) {
    %c0_i32 = arith.constant 0 : i32
    %c0_i32_0 = arith.constant 0 : i32
    %c0_i32_1 = arith.constant 0 : i32
    return %c0_i32, %c0_i32_0 : i32, i32
  }
  func.func @transform_5(%arg0: i32) -> (i32, i32) {
    %c0_i32 = arith.constant 0 : i32
    %c0_i32_0 = arith.constant 0 : i32
    %c0_i32_1 = arith.constant 0 : i32
    return %c0_i32, %c0_i32_0 : i32, i32
  }
  func.func @transform_6(%arg0: i32) -> (i32, i32) {
    %c0_i32 = arith.constant 0 : i32
    %c0_i32_0 = arith.constant 0 : i32
    %c0_i32_1 = arith.constant 0 : i32
    return %c0_i32, %c0_i32_0 : i32, i32
  }
  func.func @transform_7(%arg0: i32) -> (i32, i32) {
    %c0_i32 = arith.constant 0 : i32
    %c0_i32_0 = arith.constant 0 : i32
    %c0_i32_1 = arith.constant 0 : i32
    return %c0_i32, %c0_i32_0 : i32, i32
  }
  func.func @transform_8(%arg0: i32) -> (i32, i32) {
    %c0_i32 = arith.constant 0 : i32
    %c0_i32_0 = arith.constant 0 : i32
    %c0_i32_1 = arith.constant 0 : i32
    return %c0_i32, %c0_i32_0 : i32, i32
  }
  func.func @transform_9(%arg0: i32) -> (i32, i32) {
    %c0_i32 = arith.constant 0 : i32
    %c0_i32_0 = arith.constant 0 : i32
    return %arg0, %c0_i32 : i32, i32
  }
}

</mosaic_0001>

<bundles_post_ra>
// kernel: tpu_custom_call.1
= control target key start
LH: loop header
LB: loop body
LE: loop exit
PB: predicated region body
PF: predicated region fallthrough
CT: control target
= control target key end

     0   :  { %14 = vsyncpa [#allocation3], 0  ;;  %s986_s0 = inlined_call_operand.hbm [shape: f32[16,128], index: 0, kind: input, shape index: {}]   ;;  %s987_s1 = inlined_call_operand.hbm [shape: f32[128,128], index: 1, kind: input, shape index: {}]   ;;  %s988_s2 = inlined_call_operand.vmem [shape: f32[1,128], index: 2, kind: input, shape index: {}]   ;;  %s989_s3 = inlined_call_operand.hbm [shape: f32[128,128], index: 3, kind: input, shape index: {}]   ;;  %s990_s4 = inlined_call_operand.vmem [shape: f32[1,128], index: 4, kind: input, shape index: {}]   ;;  %s991_s5 = inlined_call_operand.hbm [shape: f32[128,128], index: 5, kind: input, shape index: {}]   ;;  %s992_s6 = inlined_call_operand.vmem [shape: f32[1,128], index: 6, kind: input, shape index: {}]   ;;  %s993_s7 = inlined_call_operand.hbm [shape: f32[128,128], index: 7, kind: input, shape index: {}]   ;;  %s994_s8 = inlined_call_operand.vmem [shape: f32[1,128], index: 8, kind: input, shape index: {}]   ;;  %s995_s9 = inlined_call_operand.hbm [shape: f32[16,128], index: 9, kind: output, shape index: {}]  }
   0x1   :  { %15 = vsyncpa [#allocation6], 0 }
   0x2   :  { %16 = vsyncpa [#allocation9], 0 }
   0x3   :  { %17 = vsyncpa [#allocation4], 0  ;;  %s880_s30 = smov [#allocation5]   ;;  %s881_s11 = smov [#allocation8]  }
   0x4   :  { %s35_s10 = sshll.u32 %s880_s30, 4  ;;  %s63_s12 = sshll.u32 %s881_s11, 4  ;;  %s36_s10 = int_to_ptr.vmem [resolvable:$true] %s35_s10  ;;  %s64_s12 = int_to_ptr.vmem [resolvable:$true] %s63_s12 }
   0x5   :  { %s760_s13 = scalar_lea.vmem %s36_s10, 2048  ;;  %p765_p1 = scmp.lt.s32.totalorder %s36_s10, %s36_s10 }
   0x6   :  { %p761_p0 = scmp.ne.s32.totalorder %s36_s10, %s760_s13  ;;  %p766_p2 = scmp.lt.s32.totalorder %s760_s13, %s760_s13 }
   0x8   :  { %p767_p3 = por %p766_p2, %p765_p1 }
   0xa   :  { %p768_p4 = pnand %p767_p3, %p761_p0 }
   0xc   :  { %771 = shalt.err (!%p768_p4)
}
   0xd   :  { %s882_s14 = smov 128   ;;  %s883_s15 = smov 8  }
   0xe   :  { %41 = dma.hbm_to_vmem [thread:$0]  %s987_s1, 2048, %s36_s10, [#allocation6], %s882_s14, %s882_s14, %s883_s15  }
   0xf   :  { %s780_s18 = scalar_lea.vmem %s64_s12, 2048  ;;  %p785_p6 = scmp.lt.s32.totalorder %s64_s12, %s64_s12 }
  0x10   :  { %p781_p5 = scmp.ne.s32.totalorder %s64_s12, %s780_s18  ;;  %p786_p7 = scmp.lt.s32.totalorder %s780_s18, %s780_s18 }
  0x12   :  { %p787_p8 = por %p786_p7, %p785_p6 }
  0x14   :  { %p788_p9 = pnand %p787_p8, %p781_p5 }
  0x16   :  { %791 = shalt.err (!%p788_p9)
}
  0x17   :  { %69 = dma.hbm_to_vmem [thread:$0]  %s991_s5, 2048, %s64_s12, [#allocation9], %s882_s14, %s882_s14, %s883_s15  }
  0x18   :  { %s884_s21 = smov [#allocation2]   ;;  %s885_s23 = smov [#allocation7]  }
  0x19   :  { %s23_s22 = sshll.u32 %s884_s21, 4  ;;  %s49_s24 = sshll.u32 %s885_s23, 4  ;;  %s24_s22 = int_to_ptr.vmem [resolvable:$true] %s23_s22  ;;  %s50_s24 = int_to_ptr.vmem [resolvable:$true] %s49_s24 }
  0x1a   :  { %s800_s1 = scalar_lea.vmem %s24_s22, 256  ;;  %p805_p11 = scmp.lt.s32.totalorder %s24_s22, %s24_s22 }
  0x1b   :  { %p801_p10 = scmp.ne.s32.totalorder %s24_s22, %s800_s1  ;;  %p806_p12 = scmp.lt.s32.totalorder %s800_s1, %s800_s1 }
  0x1d   :  { %p807_p13 = por %p806_p12, %p805_p11 }
  0x1f   :  { %p808_p0 = pnand %p807_p13, %p801_p10 }
  0x21   :  { %811 = shalt.err (!%p808_p0)
}
  0x22   :  { %29 = dma.hbm_to_vmem [thread:$0]  %s986_s0, 256, %s24_s22, [#allocation3], %s882_s14, %s882_s14, %s883_s15  }
  0x23   :  { %s820_s5 = scalar_lea.vmem %s50_s24, 2048  ;;  %p825_p2 = scmp.lt.s32.totalorder %s50_s24, %s50_s24 }
  0x24   :  { %p821_p1 = scmp.ne.s32.totalorder %s50_s24, %s820_s5  ;;  %p826_p3 = scmp.lt.s32.totalorder %s820_s5, %s820_s5 }
  0x26   :  { %p827_p4 = por %p826_p3, %p825_p2 }
  0x28   :  { %p828_p5 = pnand %p827_p4, %p821_p1 }
  0x2a   :  { %831 = shalt.err (!%p828_p5)
}
  0x2b   :  { %55 = dma.hbm_to_vmem [thread:$0]  %s989_s3, 2048, %s50_s24, [#allocation6], %s882_s14, %s882_s14, %s883_s15  }
  0x2c   :  { %s886_s29 = smov [#allocation10]  }
  0x2d   :  { %s77_s30 = sshll.u32 %s886_s29, 4  ;;  %s78_s30 = int_to_ptr.vmem [resolvable:$true] %s77_s30 }
  0x2e   :  { %s840_s10 = scalar_lea.vmem %s78_s30, 2048  ;;  %p845_p7 = scmp.lt.s32.totalorder %s78_s30, %s78_s30 }
  0x2f   :  { %p841_p6 = scmp.ne.s32.totalorder %s78_s30, %s840_s10  ;;  %p846_p8 = scmp.lt.s32.totalorder %s840_s10, %s840_s10 }
  0x31   :  { %p847_p9 = por %p846_p8, %p845_p7 }
  0x33   :  { %p848_p10 = pnand %p847_p9, %p841_p6 }
  0x35   :  { %851 = shalt.err (!%p848_p10)
}
  0x36   :  { %83 = dma.hbm_to_vmem [thread:$0]  %s993_s7, 2048, %s78_s30, [#allocation9], %s882_s14, %s882_s14, %s883_s15  }
  0x37   :  { %872 = dma.done.wait [#allocation3], 256  }
  0x38   :  { %873 = vsyncadd [#allocation3], 4294967040 }
  0x39   :  { %874 = dma.done.wait [#allocation6], 4096  }
  0x3a   :  { %875 = vsyncadd [#allocation6], 4294963200 }
  0x3b   :  { %876 = dma.done.wait [#allocation9], 4096  }
  0x3c   :  { %877 = vsyncadd [#allocation9], 4294963200  ;;  %v118_v0 = vld [vmem:[#allocation5 + $0x78] sm:$0xff]  ;;  %v117_v1 = vld [vmem:[#allocation5 + $0x70] sm:$0xff]  ;;  %s887_s18 = smov [#allocation11]  }
  0x3d   :  { %604 = vmatprep.subr.mxu0 %v118_v0  ;;  %v116_v2 = vld [vmem:[#allocation5 + $0x68] sm:$0xff]  ;;  %v115_v3 = vld [vmem:[#allocation5 + $0x60] sm:$0xff]  ;;  %v101_v4 = vld [vmem:[#allocation2] sm:$0xff]  ;;  %s514_s19 = sshll.u32 %s887_s18, 4  ;;  %s515_s19 = int_to_ptr.vmem [resolvable:$true] %s514_s19 }
  0x3e   :  { %605 = vmatpush3.msra.mxu0 %v118_v0  ;;  %v114_v5 = vld [vmem:[#allocation5 + $0x58] sm:$0xff]  ;;  %636 = vmatprep.mubr.f32.mxu0 %v101_v4  ;;  %v219_v7 = vld [vmem:[#allocation7 + $0x70] sm:$0xff]  ;;  %v218_v9 = vld [vmem:[#allocation7 + $0x68] sm:$0xff]  ;;  %p857_p12 = scmp.lt.s32.totalorder %s515_s19, %s515_s19 }
  0x3f   :  { %606 = vmatprep.subr.mxu0 %v117_v1  ;;  %v220_v6 = vld [vmem:[#allocation7 + $0x78] sm:$0xff]  ;;  %v113_v8 = vld [vmem:[#allocation5 + $0x50] sm:$0xff]  ;;  %v112_v10 = vld [vmem:[#allocation5 + $0x48] sm:$0xff] }
  0x40   :  { %607 = vmatpush3.msra.mxu0 %v117_v1  ;;  %639 = vmatprep.subr.mxu1 %v220_v6  ;;  %v217_v11 = vld [vmem:[#allocation7 + $0x60] sm:$0xff]  ;;  %v216_v13 = vld [vmem:[#allocation7 + $0x58] sm:$0xff]  ;;  %v215_v15 = vld [vmem:[#allocation7 + $0x50] sm:$0xff] }
  0x41   :  { %608 = vmatprep.subr.mxu0 %v116_v2  ;;  %640 = vmatpush3.msra.mxu1 %v220_v6  ;;  %v111_v12 = vld [vmem:[#allocation5 + $0x40] sm:$0xff]  ;;  %v110_v14 = vld [vmem:[#allocation5 + $0x38] sm:$0xff]  ;;  %v109_v16 = vld [vmem:[#allocation5 + $0x30] sm:$0xff] }
  0x42   :  { %609 = vmatpush3.msra.mxu0 %v116_v2  ;;  %641 = vmatprep.subr.mxu1 %v219_v7  ;;  %v214_v17 = vld [vmem:[#allocation7 + $0x48] sm:$0xff]  ;;  %v213_v19 = vld [vmem:[#allocation7 + $0x40] sm:$0xff]  ;;  %v212_v21 = vld [vmem:[#allocation7 + $0x38] sm:$0xff] }
  0x43   :  { %610 = vmatprep.subr.mxu0 %v115_v3  ;;  %642 = vmatpush3.msra.mxu1 %v219_v7  ;;  %v108_v18 = vld [vmem:[#allocation5 + $0x28] sm:$0xff]  ;;  %v107_v20 = vld [vmem:[#allocation5 + $0x20] sm:$0xff]  ;;  %v106_v22 = vld [vmem:[#allocation5 + $0x18] sm:$0xff] }
  0x44   :  { %611 = vmatpush3.msra.mxu0 %v115_v3  ;;  %643 = vmatprep.subr.mxu1 %v218_v9  ;;  %v211_v23 = vld [vmem:[#allocation7 + $0x30] sm:$0xff]  ;;  %v210_v25 = vld [vmem:[#allocation7 + $0x28] sm:$0xff]  ;;  %v103_v27 = vld [vmem:[#allocation5] sm:$0xff] }
  0x45   :  { %612 = vmatprep.subr.mxu0 %v114_v5  ;;  %644 = vmatpush3.msra.mxu1 %v218_v9  ;;  %v105_v24 = vld [vmem:[#allocation5 + $0x10] sm:$0xff]  ;;  %v104_v26 = vld [vmem:[#allocation5 + $0x8] sm:$0xff]  ;;  %v102_v28 = vld [vmem:[#allocation2 + $0x8] sm:$0xff] }
  0x46   :  { %613 = vmatpush3.msra.mxu0 %v114_v5  ;;  %645 = vmatprep.subr.mxu1 %v217_v11  ;;  %v209_v29 = vld [vmem:[#allocation7 + $0x20] sm:$0xff]  ;;  %v208_v30 = vld [vmem:[#allocation7 + $0x18] sm:$0xff]  ;;  %v207_v31 = vld [vmem:[#allocation7 + $0x10] sm:$0xff] }
  0x47   :  { %614 = vmatprep.subr.mxu0 %v113_v8  ;;  %646 = vmatpush3.msra.mxu1 %v217_v11  ;;  %v206_v32 = vld [vmem:[#allocation7 + $0x8] sm:$0xff]  ;;  %v205_v33 = vld [vmem:[#allocation7] sm:$0xff]  ;;  %v322_v34 = vld [vmem:[#allocation8 + $0x78] sm:$0xff] }
  0x48   :  { %615 = vmatpush3.msra.mxu0 %v113_v8  ;;  %647 = vmatprep.subr.mxu1 %v216_v13  ;;  %v321_v35 = vld [vmem:[#allocation8 + $0x70] sm:$0xff]  ;;  %v320_v36 = vld [vmem:[#allocation8 + $0x68] sm:$0xff]  ;;  %v319_v37 = vld [vmem:[#allocation8 + $0x60] sm:$0xff] }
  0x49   :  { %616 = vmatprep.subr.mxu0 %v112_v10  ;;  %648 = vmatpush3.msra.mxu1 %v216_v13  ;;  %v318_v38 = vld [vmem:[#allocation8 + $0x58] sm:$0xff]  ;;  %v317_v39 = vld [vmem:[#allocation8 + $0x50] sm:$0xff]  ;;  %v316_v40 = vld [vmem:[#allocation8 + $0x48] sm:$0xff] }
  0x4a   :  { %617 = vmatpush3.msra.mxu0 %v112_v10  ;;  %649 = vmatprep.subr.mxu1 %v215_v15  ;;  %v315_v41 = vld [vmem:[#allocation8 + $0x40] sm:$0xff]  ;;  %v314_v42 = vld [vmem:[#allocation8 + $0x38] sm:$0xff]  ;;  %v313_v43 = vld [vmem:[#allocation8 + $0x30] sm:$0xff] }
  0x4b   :  { %618 = vmatprep.subr.mxu0 %v111_v12  ;;  %650 = vmatpush3.msra.mxu1 %v215_v15  ;;  %v312_v44 = vld [vmem:[#allocation8 + $0x28] sm:$0xff]  ;;  %v528_v45 = vld [vmem:[%s988_s2] ss:$0 sm:$0xff]  ;;  %v311_v54 = vld [vmem:[#allocation8 + $0x20] sm:$0xff] }
  0x4c   :  { %619 = vmatpush3.msra.mxu0 %v111_v12  ;;  %651 = vmatprep.subr.mxu1 %v214_v17  ;;  %v310_v55 = vld [vmem:[#allocation8 + $0x18] sm:$0xff]  ;;  %v309_v56 = vld [vmem:[#allocation8 + $0x10] sm:$0xff]  ;;  %v308_v57 = vld [vmem:[#allocation8 + $0x8] sm:$0xff] }
  0x4d   :  { %620 = vmatprep.subr.mxu0 %v110_v14  ;;  %652 = vmatpush3.msra.mxu1 %v214_v17  ;;  %v307_v58 = vld [vmem:[#allocation8] sm:$0xff]  ;;  %v424_v59 = vld [vmem:[#allocation10 + $0x78] sm:$0xff]  ;;  %v423_v60 = vld [vmem:[#allocation10 + $0x70] sm:$0xff] }
  0x4e   :  { %621 = vmatpush3.msra.mxu0 %v110_v14  ;;  %653 = vmatprep.subr.mxu1 %v213_v19  ;;  %v422_v61 = vld [vmem:[#allocation10 + $0x68] sm:$0xff]  ;;  %v421_v62 = vld [vmem:[#allocation10 + $0x60] sm:$0xff]  ;;  %v420_v63 = vld [vmem:[#allocation10 + $0x58] sm:$0xff] }
  0x4f   :  { %622 = vmatprep.subr.mxu0 %v109_v16  ;;  %654 = vmatpush3.msra.mxu1 %v213_v19  ;;  %v419_v0 = vld [vmem:[#allocation10 + $0x50] sm:$0xff]  ;;  %v418_v1 = vld [vmem:[#allocation10 + $0x48] sm:$0xff]  ;;  %v417_v2 = vld [vmem:[#allocation10 + $0x40] sm:$0xff] }
  0x50   :  { %623 = vmatpush3.msra.mxu0 %v109_v16  ;;  %655 = vmatprep.subr.mxu1 %v212_v21  ;;  %v416_v3 = vld [vmem:[#allocation10 + $0x38] sm:$0xff]  ;;  %v415_v4 = vld [vmem:[#allocation10 + $0x30] sm:$0xff]  ;;  %v414_v5 = vld [vmem:[#allocation10 + $0x28] sm:$0xff] }
  0x51   :  { %624 = vmatprep.subr.mxu0 %v108_v18  ;;  %656 = vmatpush3.msra.mxu1 %v212_v21  ;;  %v529_v6 = vld [vmem:[%s990_s4] ss:$0 sm:$0xff]  ;;  %v413_v15 = vld [vmem:[#allocation10 + $0x20] sm:$0xff]  ;;  %v412_v16 = vld [vmem:[#allocation10 + $0x18] sm:$0xff] }
  0x52   :  { %625 = vmatpush3.msra.mxu0 %v108_v18  ;;  %657 = vmatprep.subr.mxu1 %v211_v23  ;;  %v411_v17 = vld [vmem:[#allocation10 + $0x10] sm:$0xff]  ;;  %v410_v18 = vld [vmem:[#allocation10 + $0x8] sm:$0xff]  ;;  %v409_v19 = vld [vmem:[#allocation10] sm:$0xff] }
  0x53   :  { %626 = vmatprep.subr.mxu0 %v107_v20  ;;  %658 = vmatpush3.msra.mxu1 %v211_v23 }
  0x54   :  { %627 = vmatpush3.msra.mxu0 %v107_v20  ;;  %659 = vmatprep.subr.mxu1 %v210_v25  ;;  %v530_v20 = vld [vmem:[%s992_s6] ss:$0 sm:$0xff]  ;;  %s852_s6 = scalar_lea.vmem %s515_s19, 256 }
  0x55   :  { %628 = vmatprep.subr.mxu0 %v106_v22  ;;  %660 = vmatpush3.msra.mxu1 %v210_v25  ;;  %p853_p11 = scmp.ne.s32.totalorder %s515_s19, %s852_s6  ;;  %p858_p13 = scmp.lt.s32.totalorder %s852_s6, %s852_s6 }
  0x56   :  { %629 = vmatpush3.msra.mxu0 %v106_v22  ;;  %661 = vmatprep.subr.mxu1 %v209_v29 }
  0x57   :  { %630 = vmatprep.subr.mxu0 %v105_v24  ;;  %662 = vmatpush3.msra.mxu1 %v209_v29  ;;  %v531_v29 = vld [vmem:[%s994_s8] ss:$0 sm:$0xff]  ;;  %p859_p0 = por %p858_p13, %p857_p12 }
  0x58   :  { %631 = vmatpush3.msra.mxu0 %v105_v24  ;;  %663 = vmatprep.subr.mxu1 %v208_v30 }
  0x59   :  { %632 = vmatprep.subr.mxu0 %v104_v26  ;;  %664 = vmatpush3.msra.mxu1 %v208_v30  ;;  %p860_p1 = pnand %p859_p0, %p853_p11 }
  0x5a   :  { %633 = vmatpush3.msra.mxu0 %v104_v26  ;;  %665 = vmatprep.subr.mxu1 %v207_v31 }
  0x5b   :  { %634 = vmatprep.subr.mxu0 %v103_v27  ;;  %666 = vmatpush3.msra.mxu1 %v207_v31 }
  0x5c   :  { %635 = vmatpush3.msra.mxu0 %v103_v27  ;;  %667 = vmatprep.subr.mxu1 %v206_v32 }
  0x5d   :  { %637 = vmatmul.mubr.f32.vlgmr.msra.gmra.mxu0 %v102_v28  ;;  %668 = vmatpush3.msra.mxu1 %v206_v32 }
  0x5e   :  { %669 = vmatprep.subr.mxu1 %v205_v33  ;;  %674 = vmatprep.subr.mxu0 %v322_v34 }
  0x5f   :  { %670 = vmatpush3.msra.mxu1 %v205_v33  ;;  %675 = vmatpush3.msra.mxu0 %v322_v34 }
  0x60   :  { %676 = vmatprep.subr.mxu0 %v321_v35  ;;  %709 = vmatprep.subr.mxu1 %v424_v59 }
  0x61   :  { %677 = vmatpush3.msra.mxu0 %v321_v35 }
  0x62   :  { %678 = vmatprep.subr.mxu0 %v320_v36 }
  0x63   :  { %679 = vmatpush3.msra.mxu0 %v320_v36 }
  0x64   :  { %680 = vmatprep.subr.mxu0 %v319_v37 }
  0x65   :  { %681 = vmatpush3.msra.mxu0 %v319_v37 }
  0x66   :  { %682 = vmatprep.subr.mxu0 %v318_v38 }
  0x67   :  { %683 = vmatpush3.msra.mxu0 %v318_v38 }
  0x68   :  { %684 = vmatprep.subr.mxu0 %v317_v39 }
  0x69   :  { %685 = vmatpush3.msra.mxu0 %v317_v39 }
  0x6a   :  { %686 = vmatprep.subr.mxu0 %v316_v40 }
  0x6b   :  { %687 = vmatpush3.msra.mxu0 %v316_v40 }
  0x6c   :  { %688 = vmatprep.subr.mxu0 %v315_v41 }
  0x6d   :  { %689 = vmatpush3.msra.mxu0 %v315_v41 }
  0x6e   :  { %690 = vmatprep.subr.mxu0 %v314_v42 }
  0x6f   :  { %691 = vmatpush3.msra.mxu0 %v314_v42 }
  0x70   :  { %692 = vmatprep.subr.mxu0 %v313_v43 }
  0x71   :  { %693 = vmatpush3.msra.mxu0 %v313_v43 }
  0x72   :  { %694 = vmatprep.subr.mxu0 %v312_v44 }
  0x73   :  { %695 = vmatpush3.msra.mxu0 %v312_v44 }
  0x74   :  { %696 = vmatprep.subr.mxu0 %v311_v54 }
  0x75   :  { %697 = vmatpush3.msra.mxu0 %v311_v54 }
  0x76   :  { %698 = vmatprep.subr.mxu0 %v310_v55 }
  0x77   :  { %699 = vmatpush3.msra.mxu0 %v310_v55 }
  0x78   :  { %700 = vmatprep.subr.mxu0 %v309_v56 }
  0x79   :  { %701 = vmatpush3.msra.mxu0 %v309_v56 }
  0x7a   :  { %702 = vmatprep.subr.mxu0 %v308_v57 }
  0x7b   :  { %703 = vmatpush3.msra.mxu0 %v308_v57 }
  0x7c   :  { %704 = vmatprep.subr.mxu0 %v307_v58 }
  0x7d   :  { %705 = vmatpush3.msra.mxu0 %v307_v58 }
 0x11d   :  { %v638_v46 = vpop.f32.mrf.mxu0 }
 0x11e   :  { %v198_v47 = vadd.f32 %v638_v46, %v528_v45 }
 0x11f   :  { %v192_v48 = vpop.f32.mrf.mxu0 }
 0x120   :  { %v193_v49 = vadd.f32 %v528_v45, %v192_v48  ;;  %v202_v50 = vmul.f32 0.2, %v198_v47 }
 0x122   :  { %v201_v51 = vmul.f32 0.2, %v193_v49  ;;  %v204_v53 = vmax.f32 %v198_v47, %v202_v50 }
 0x124   :  { %v203_v52 = vmax.f32 %v193_v49, %v201_v51 }
 0x126   :  { %671 = vmatprep.mubr.f32.mxu1 %v203_v52 }
 0x127   :  { %672 = vmatmul.mubr.f32.vlgmr.msra.gmra.mxu1 %v204_v53 }
 0x128   :  { %710 = vmatpush3.msra.mxu1 %v424_v59 }
 0x129   :  { %711 = vmatprep.subr.mxu1 %v423_v60 }
 0x12a   :  { %712 = vmatpush3.msra.mxu1 %v423_v60 }
 0x12b   :  { %713 = vmatprep.subr.mxu1 %v422_v61 }
 0x12c   :  { %714 = vmatpush3.msra.mxu1 %v422_v61 }
 0x12d   :  { %715 = vmatprep.subr.mxu1 %v421_v62 }
 0x12e   :  { %716 = vmatpush3.msra.mxu1 %v421_v62 }
 0x12f   :  { %717 = vmatprep.subr.mxu1 %v420_v63 }
 0x130   :  { %718 = vmatpush3.msra.mxu1 %v420_v63 }
 0x131   :  { %719 = vmatprep.subr.mxu1 %v419_v0 }
 0x132   :  { %720 = vmatpush3.msra.mxu1 %v419_v0 }
 0x133   :  { %721 = vmatprep.subr.mxu1 %v418_v1 }
 0x134   :  { %722 = vmatpush3.msra.mxu1 %v418_v1 }
 0x135   :  { %723 = vmatprep.subr.mxu1 %v417_v2 }
 0x136   :  { %724 = vmatpush3.msra.mxu1 %v417_v2 }
 0x137   :  { %725 = vmatprep.subr.mxu1 %v416_v3 }
 0x138   :  { %726 = vmatpush3.msra.mxu1 %v416_v3 }
 0x139   :  { %727 = vmatprep.subr.mxu1 %v415_v4 }
 0x13a   :  { %728 = vmatpush3.msra.mxu1 %v415_v4 }
 0x13b   :  { %729 = vmatprep.subr.mxu1 %v414_v5 }
 0x13c   :  { %730 = vmatpush3.msra.mxu1 %v414_v5 }
 0x13d   :  { %731 = vmatprep.subr.mxu1 %v413_v15 }
 0x13e   :  { %732 = vmatpush3.msra.mxu1 %v413_v15 }
 0x13f   :  { %733 = vmatprep.subr.mxu1 %v412_v16 }
 0x140   :  { %734 = vmatpush3.msra.mxu1 %v412_v16 }
 0x141   :  { %735 = vmatprep.subr.mxu1 %v411_v17 }
 0x142   :  { %736 = vmatpush3.msra.mxu1 %v411_v17 }
 0x143   :  { %737 = vmatprep.subr.mxu1 %v410_v18 }
 0x144   :  { %738 = vmatpush3.msra.mxu1 %v410_v18 }
 0x145   :  { %739 = vmatprep.subr.mxu1 %v409_v19 }
 0x146   :  { %740 = vmatpush3.msra.mxu1 %v409_v19 }
 0x1e7   :  { %v673_v7 = vpop.f32.mrf.mxu1 }
 0x1e8   :  { %v300_v8 = vadd.f32 %v673_v7, %v529_v6 }
 0x1e9   :  { %v294_v9 = vpop.f32.mrf.mxu1 }
 0x1ea   :  { %v295_v10 = vadd.f32 %v529_v6, %v294_v9  ;;  %v304_v11 = vmul.f32 0.2, %v300_v8 }
 0x1ec   :  { %v303_v12 = vmul.f32 0.2, %v295_v10  ;;  %v306_v14 = vmax.f32 %v300_v8, %v304_v11 }
 0x1ee   :  { %v305_v13 = vmax.f32 %v295_v10, %v303_v12 }
 0x1f0   :  { %706 = vmatprep.mubr.f32.mxu0 %v305_v13 }
 0x1f1   :  { %707 = vmatmul.mubr.f32.vlgmr.msra.gmra.mxu0 %v306_v14 }
 0x2b1   :  { %v708_v21 = vpop.f32.mrf.mxu0 }
 0x2b2   :  { %v402_v22 = vadd.f32 %v708_v21, %v530_v20 }
 0x2b3   :  { %v396_v23 = vpop.f32.mrf.mxu0 }
 0x2b4   :  { %v397_v24 = vadd.f32 %v530_v20, %v396_v23  ;;  %v406_v25 = vmul.f32 0.2, %v402_v22 }
 0x2b6   :  { %v405_v26 = vmul.f32 0.2, %v397_v24  ;;  %v408_v28 = vmax.f32 %v402_v22, %v406_v25 }
 0x2b8   :  { %v407_v27 = vmax.f32 %v397_v24, %v405_v26 }
 0x2ba   :  { %741 = vmatprep.mubr.f32.mxu1 %v407_v27 }
 0x2bb   :  { %742 = vmatmul.mubr.f32.vlgmr.msra.gmra.mxu1 %v408_v28 }
 0x37b   :  { %v743_v30 = vpop.f32.mrf.mxu1 }
 0x37c   :  { %v504_v31 = vadd.f32 %v743_v30, %v531_v29 }
 0x37d   :  { %v498_v32 = vpop.f32.mrf.mxu1 }
 0x37e   :  { %508 = vst [vmem:[#allocation11 + $0x8] sm:$0xff] %v504_v31  ;;  %v499_v33 = vadd.f32 %v531_v29, %v498_v32 }
 0x380   :  { %507 = vst [vmem:[#allocation11] sm:$0xff] %v499_v33 }
 0x381   :  { %863 = shalt.err (!%p860_p1)
}
 0x382   :  { %520 = dma.vmem_to_hbm [thread:$0]  %s515_s19, 256, %s995_s9, [#allocation4], %s882_s14, %s882_s14, %s883_s15  }
 0x383   :  { %878 = dma.done.wait [#allocation4], 256  }
 0x384   :  { %879 = vsyncadd [#allocation4], 4294967040 }
 0x385   :  { %524 = vsyncpa [#allocation3], 1 }
 0x386   :  { %525 = vsyncpa [#allocation6], 1 }
 0x387   :  { %526 = vsyncpa [#allocation9], 1 }
 0x388   :  { %527 = vsyncpa [#allocation4], 1 }

</bundles_post_ra>
